<compile_context>
chip_gen: v7x
topology: tpu7x:2x2x1
jax: 0.10.0
libtpu: 0.0.40
codegen_flags: <defaults>
</compile_context>

<pallas_src>
import math

import jax
import jax.numpy as jnp
import numpy as np
from jax.experimental import pallas as pl
from jax.experimental.pallas import tpu as pltpu

# ----------------------------- configuration --------------------------------
RGB_C, FLOW_C = 4, 4
CIN = RGB_C + FLOW_C          # concatenated channels
COUT = 8                      # out_channels
KSIZE = 3                     # spatial kernel
STRIDE = 1                    # module instances use stride=1 (fast path assumes it)
TKSIZE, TSTRIDE = 1, 1        # module defaults (temporal kernel is pointwise)
B, T, H, W = 2, 4, 16, 16     # small demo shapes
TCHUNK = 2                    # frames per pooling grid step (raise at real sizes)
TCONV = 2                     # frames per conv grid step

PAD = (KSIZE - 1) // 2
HO = (H + 2 * PAD - KSIZE) // STRIDE + 1
WO = (W + 2 * PAD - KSIZE) // STRIDE + 1

WC_R = W * RGB_C              # rgb lanes per row (w-major, channel-minor)
WC_F = W * FLOW_C             # flow lanes per row
WC = WC_R + WC_F              # merged contraction width = W * CIN
NOUT = WO * COUT              # output lane width

# Vertically padded per-frame row stride in the conv scratch: 8-aligned frame
# bases so the pad-copy stores and the tap-combine slices never straddle
# sublane tiles, and the roll-wrap rows stay on zero-padding rows.
RS = ((H + PAD + 7) // 8) * 8

assert STRIDE == 1, "fast path assumes stride=1 (as used by the module)"
assert WC == 128 and NOUT == 128      # exactly one MXU K-pass / lane-dense stores
assert T % TCHUNK == 0 and T % TCONV == 0
assert RS >= H + PAD and RS % 8 == 0

# ECA kernel size formula from ChannAT.__init__ (b=1, gamma=2)
K_ECA = int(abs((math.log(CIN, 2) + 1) / 2))
K_ECA = K_ECA if K_ECA % 2 else K_ECA + 1
PAD_ECA = K_ECA // 2


# ------------------------------ Pallas kernels -------------------------------
def _eca_scale_kernel(xr_ref, xf_ref, red_ref, exp_ref, scale_ref, acc_ref):
    """Chunked global-avg-pool + ECA channel conv + sigmoid -> residual lane scale.

    grid = (B, T // TCHUNK).  The chunk axis ("arbitrary", last) accumulates the
    pooled per-lane sum in a VMEM scratch; the last chunk folds lanes -> channels
    (selector matmul with the banded ECA taps folded in), applies sigmoid, and
    expands sigmoid(y)+1 back to the (W*CIN)-lane vector the conv kernel uses.

      xr_ref:    (1, TCHUNK, H, W*RGB_C)   lane-merged rgb chunk (w-major, c-minor)
      xf_ref:    (1, TCHUNK, H, W*FLOW_C)  lane-merged flow chunk
      red_ref:   (W*CIN, CIN)   lane->channel selector @ banded ECA taps / (T*H*W)
      exp_ref:   (CIN, W*CIN)   channel->lane expander
      scale_ref: (1, 1, W*CIN)  output: sigmoid(y) + 1 broadcast to the conv lanes
      acc_ref:   (1, W*CIN)     running pooled lane sum (VMEM scratch)
    """
    c = pl.program_id(1)

    @pl.when(c == 0)
    def _init():
        acc_ref[...] = jnp.zeros_like(acc_ref)

    xr = xr_ref[0].astype(jnp.float32)                      # (TCHUNK, H, WC_R)
    xf = xf_ref[0].astype(jnp.float32)
    sr = jnp.sum(xr, axis=(0, 1), keepdims=True)[0]         # (1, WC_R)
    sf = jnp.sum(xf, axis=(0, 1), keepdims=True)[0]         # (1, WC_F)
    acc_ref[...] += jnp.concatenate([sr, sf], axis=-1)      # (1, WC) full-lane

    @pl.when(c == pl.num_programs(1) - 1)
    def _finalize():
        y = jnp.dot(acc_ref[...], red_ref[...],
                    preferred_element_type=jnp.float32)     # (1, CIN)  avg+ECA
        s = jax.nn.sigmoid(y) + 1.0                         # x*sig(y) + x
        scale_ref[0] = jnp.dot(s, exp_ref[...],
                               preferred_element_type=jnp.float32)   # (1, WC)


def _conv_kernel(xr_ref, xf_ref, w_ref, s_ref, o_ref, xpad_ref):
    """Fused (ECA-scaled) Conv3d with temporal kernel 1, TCONV frames per step.

      xr_ref:   (1, TCONV, H, W*RGB_C)   lane-merged rgb frames
      xf_ref:   (1, TCONV, H, W*FLOW_C)  lane-merged flow frames
      w_ref:    (KSIZE, W*CIN, WO*COUT)  bf16 structured weights per vertical tap;
                horizontal taps, channel mixing, left/right boundary masking and
                the rgb/flow channel concat are all folded in (K = W*CIN = 128).
      s_ref:    (1, 1, W*CIN)            per-batch ECA lane scale (sigmoid(y)+1)
      o_ref:    (1, TCONV, HO, WO*COUT)  lane-dense output (128 lanes, unmasked)
      xpad_ref: (TCONV*RS, W*CIN) f32    vertically zero-padded frames; frame t
                occupies rows [t*RS, t*RS+H) (8-aligned); no horizontal padding.
    """
    nrows = TCONV * RS
    xpad_ref[...] = jnp.zeros_like(xpad_ref)
    sc = s_ref[0].astype(jnp.float32)                       # (1, WC)

    # ECA scale + rgb/flow lane-concat fused into the pad-copy: one full-lane,
    # 8-aligned (H, 128) store per frame; the concat never touches HBM.
    for t in range(TCONV):
        fr = jnp.concatenate(
            [xr_ref[0, t].astype(jnp.float32),
             xf_ref[0, t].astype(jnp.float32)], axis=-1) * sc
        xpad_ref[t * RS:t * RS + H, :] = fr

    # One K=128 bf16 MXU matmul per vertical tap, combined with XLU sublane
    # rolls (wrap rows land on zero-pad rows, contributing nothing).
    xb = xpad_ref[...].astype(jnp.bfloat16)
    acc = None
    for dy in range(KSIZE):
        p = jnp.dot(xb, w_ref[dy], preferred_element_type=jnp.float32)
        shift = (PAD - dy) % nrows
        if shift:
            p = pltpu.roll(p, shift, axis=0)
        acc = p if acc is None else acc + p

    # Aligned (HO, 128) slabs -> plain unmasked vector stores.
    for t in range(TCONV):
        o_ref[0, t] = acc[t * RS:t * RS + HO, :].astype(o_ref.dtype)


# ------------------------------ weight builders -------------------------------
def _build_eca_band(taps, c, pad):
    """Express the zero-padded 1-D channel conv as a (C, C) banded matrix so the
    kernel can apply it with a single small matmul:  y = m @ band."""
    j = jnp.arange(c)[:, None]
    i = jnp.arange(c)[None, :]
    p = j - i + pad
    valid = (p >= 0) & (p < taps.shape[0])
    return jnp.where(valid, taps[jnp.clip(p, 0, taps.shape[0] - 1)], 0.0)


def _build_wmat_half(w_half):
    """Fold horizontal taps + channel mixing + the left/right zero-pad boundary of
    one stream into per-dy structured matrices over *unpadded* columns:
        Wmat[dy, wi*C + ci, wo*COUT + co] = w[dy, wi - wo*S + PAD, ci, co]
    (zero when the tap index falls outside [0, KW)), so a padded row of the
    activations times Wmat[dy] yields every (wo, co) output in one MXU pass."""
    kh, kw, ch, cout = w_half.shape
    wi = jnp.arange(W)[:, None]
    wo = jnp.arange(WO)[None, :]
    dx = wi - wo * STRIDE + PAD                              # (W, WO)
    valid = (dx >= 0) & (dx < kw)
    sel = w_half[:, jnp.clip(dx, 0, kw - 1), :, :]           # (kh, W, WO, ch, cout)
    sel = sel * valid[None, :, :, None, None].astype(w_half.dtype)
    sel = jnp.transpose(sel, (0, 1, 3, 2, 4))                # (kh, W, ch, WO, cout)
    return sel.reshape(kh, W * ch, WO * cout)


# ------------------------------- wrapper -------------------------------------
def tsatt_block_forward(xrgb, xflow, w_conv, eca_taps):
    """xrgb: (B, RGB_C, T, H, W), xflow: (B, FLOW_C, T, H, W)  (PyTorch NCTHW).
    Returns (B, COUT, T, HO, WO) in NCTHW."""
    # Single lane-merged channels-last view per stream, shared by BOTH kernels
    # (the rgb/flow concat and all padding happen inside the kernels).
    # TODO(synk): at real sizes the upstream producers should emit this layout
    # directly (or the relayout be fused into the pooling kernel) so these
    # wrapper transposes disappear entirely.
    xr4 = jnp.transpose(xrgb, (0, 2, 3, 4, 1)).reshape(B, T, H, WC_R)
    xf4 = jnp.transpose(xflow, (0, 2, 3, 4, 1)).reshape(B, T, H, WC_F)

    # lane -> channel selector (rgb lanes first, then flow; w-major, c-minor).
    chan = jnp.concatenate([jnp.arange(WC_R) % RGB_C,
                            RGB_C + jnp.arange(WC_F) % FLOW_C])
    sel = (chan[:, None] == jnp.arange(CIN)[None, :]).astype(jnp.float32)
    band = _build_eca_band(eca_taps.astype(jnp.float32), CIN, PAD_ECA)
    red_mat = jnp.dot(sel, band) / float(T * H * W)          # (WC, CIN)
    exp_mat = jnp.transpose(sel)                             # (CIN, WC)

    # --- kernel 1: chunked avg-pool + ECA conv + sigmoid -> lane scale --------
    scale = pl.pallas_call(
        _eca_scale_kernel,
        out_shape=jax.ShapeDtypeStruct((B, 1, WC), jnp.float32),
        grid=(B, T // TCHUNK),
        in_specs=[
            pl.BlockSpec((1, TCHUNK, H, WC_R), lambda b, c: (b, c, 0, 0)),
            pl.BlockSpec((1, TCHUNK, H, WC_F), lambda b, c: (b, c, 0, 0)),
            pl.BlockSpec((WC, CIN), lambda b, c: (0, 0)),
            pl.BlockSpec((CIN, WC), lambda b, c: (0, 0)),
        ],
        out_specs=pl.BlockSpec((1, 1, WC), lambda b, c: (b, 0, 0)),
        scratch_shapes=[pltpu.VMEM((1, WC), jnp.float32)],
        compiler_params=pltpu.CompilerParams(
            dimension_semantics=("parallel", "arbitrary")),
    )(xr4, xf4, red_mat, exp_mat)                            # (B, 1, WC)

    # Structured conv weights: rgb rows stacked above flow rows along K (this
    # K-axis concat realizes the channel concat), bf16 storage for the MXU bf16
    # path and half the weight DMA / VMEM.  Batch-invariant (no scale folded in).
    wmat = jnp.concatenate(
        [_build_wmat_half(w_conv[:, :, :RGB_C, :].astype(jnp.float32)),
         _build_wmat_half(w_conv[:, :, RGB_C:, :].astype(jnp.float32))],
        axis=1).astype(jnp.bfloat16)                         # (KSIZE, WC, NOUT)

    # --- kernel 2: fused scale + Conv3d (tksize=1), (B, T) grid ---------------
    # TODO(synk): at real feature-map widths, single-buffer the constant weight
    # slab (pipeline_mode=pl.Buffered(1)) and tile the wo axis into the grid so
    # the O(W^2) structured weight stays inside v7x's 64 MiB VMEM budget.
    out = pl.pallas_call(
        _conv_kernel,
        out_shape=jax.ShapeDtypeStruct((B, T, HO, NOUT), jnp.float32),
        grid=(B, T // TCONV),
        in_specs=[
            pl.BlockSpec((1, TCONV, H, WC_R), lambda b, tc: (b, tc, 0, 0)),
            pl.BlockSpec((1, TCONV, H, WC_F), lambda b, tc: (b, tc, 0, 0)),
            pl.BlockSpec((KSIZE, WC, NOUT), lambda b, tc: (0, 0, 0)),
            pl.BlockSpec((1, 1, WC), lambda b, tc: (b, 0, 0)),
        ],
        out_specs=pl.BlockSpec((1, TCONV, HO, NOUT), lambda b, tc: (b, tc, 0, 0)),
        scratch_shapes=[pltpu.VMEM((TCONV * RS, WC), jnp.float32)],
        compiler_params=pltpu.CompilerParams(
            dimension_semantics=("parallel", "parallel")),
    )(xr4, xf4, wmat, scale)                                 # (B, T, HO, NOUT)

    out = out.reshape(B, T, HO, WO, COUT)
    return jnp.transpose(out, (0, 4, 1, 2, 3))               # back to NCTHW


# ------------------------------ reference ------------------------------------
def reference_forward(xrgb, xflow, w_conv, eca_taps):
    """Pure-JAX reference matching the PyTorch forward exactly (NCTHW, f32)."""
    x = jnp.concatenate([xrgb, xflow], axis=1)               # (B, C, T, H, W)
    c = x.shape[1]
    m = jnp.mean(x, axis=(2, 3, 4))                          # (B, C)
    mp = jnp.pad(m, ((0, 0), (PAD_ECA, PAD_ECA)))
    y = sum(eca_taps[p] * mp[:, p:p + c] for p in range(K_ECA))
    s = jax.nn.sigmoid(y)[:, :, None, None, None]
    x = x * s + x
    w = jnp.transpose(w_conv, (3, 2, 0, 1))[:, :, None, :, :]  # (Cout,Cin,1,kh,kw)
    return jax.lax.conv_general_dilated(
        x, w,
        window_strides=(TSTRIDE, STRIDE, STRIDE),
        padding=((0, 0), (PAD, PAD), (PAD, PAD)),
        dimension_numbers=("NCDHW", "OIDHW", "NCDHW"))


# --------------------------------- main ---------------------------------------
if __name__ == "__main__":
    key = jax.random.PRNGKey(0)
    k1, k2, k3, k4 = jax.random.split(key, 4)

    xrgb = jax.random.normal(k1, (B, RGB_C, T, H, W), jnp.float32)
    xflow = jax.random.normal(k2, (B, FLOW_C, T, H, W), jnp.float32)

    # Conv3d weight (no bias); layout (kh, kw, Cin, Cout), temporal size 1.
    w_conv = jax.random.normal(k3, (KSIZE, KSIZE, CIN, COUT), jnp.float32) * 0.05

    # ECA Conv2d weight is (1, 1, K_ECA, K_ECA); only its centre column acts on
    # the (C, 1) pooled map, so the effective operator is a length-K_ECA 1-D conv
    # over channels.  NOTE: the PyTorch module zero-inits this weight
    # (init_zero=True) -- random taps here so the ECA path is actually exercised.
    eca_w2d = jax.random.normal(k4, (1, 1, K_ECA, K_ECA), jnp.float32) * 0.1
    eca_taps = eca_w2d[0, 0, :, K_ECA // 2]                   # (K_ECA,)

    out = jax.block_until_ready(tsatt_block_forward(xrgb, xflow, w_conv, eca_taps))
    ref = jax.block_until_ready(reference_forward(xrgb, xflow, w_conv, eca_taps))

    # bf16 MXU path for the conv -> relaxed tolerance (accumulation stays f32).
    np.testing.assert_allclose(np.asarray(out), np.asarray(ref),
                               rtol=2e-2, atol=2e-2)
    print("KERNEL_OK")
</pallas_src>

<mosaic_0001>
module attributes {stable_mosaic.version = 11 : i64} {
  func.func @_eca_scale_kernel(%arg0: i32, %arg1: i32, %arg2: memref<1x2x16x64xf32, #tpu.memory_space<vmem>>, %arg3: memref<1x2x16x64xf32, #tpu.memory_space<vmem>>, %arg4: memref<128x8xf32, #tpu.memory_space<vmem>>, %arg5: memref<8x128xf32, #tpu.memory_space<vmem>>, %arg6: memref<1x1x128xf32, #tpu.memory_space<vmem>>, %arg7: memref<1x128xf32, #tpu.memory_space<vmem>>) attributes {dimension_semantics = [#tpu.dimension_semantics<parallel>, #tpu.dimension_semantics<arbitrary>], iteration_bounds = array<i64: 2, 2>, scalar_prefetch = 0 : i64, scratch_operands = 1 : i64, tpu.core_type = #tpu.core_type<tc>, window_params = [{transform_indices = @transform_0, window_bounds = array<i64: 1, 2, 16, 64>}, {transform_indices = @transform_1, window_bounds = array<i64: 1, 2, 16, 64>}, {pipeline_mode = #tpu.pipeline_mode<synchronous>, transform_indices = @transform_2, window_bounds = array<i64: 128, 8>}, {pipeline_mode = #tpu.pipeline_mode<synchronous>, transform_indices = @transform_3, window_bounds = array<i64: 8, 128>}, {transform_indices = @transform_4, window_bounds = array<i64: 1, 1, 128>}]} {
    %c0_i32 = arith.constant 0 : i32
    %0 = arith.cmpi eq, %arg1, %c0_i32 : i32
    %1 = arith.extui %0 : i1 to i32
    %c0_i32_0 = arith.constant 0 : i32
    %2 = arith.cmpi ne, %1, %c0_i32_0 : i32
    scf.if %2 {
      %cst_14 = arith.constant 0.000000e+00 : f32
      %20 = vector.broadcast %cst_14 : f32 to vector<1x128xf32>
      %c0_15 = arith.constant 0 : index
      %c0_16 = arith.constant 0 : index
      %21 = vector.load %arg7[%c0_15, %c0_16] : memref<1x128xf32, #tpu.memory_space<vmem>>, vector<1x128xf32>
      tpu.vector_store %arg7[%c0_15, %c0_16], %20 {strides = array<i32>} : memref<1x128xf32, #tpu.memory_space<vmem>>, vector<1x128xf32>,
    } else {
    }
    %c0 = arith.constant 0 : index
    %c0_1 = arith.constant 0 : index
    %c0_2 = arith.constant 0 : index
    %c0_3 = arith.constant 0 : index
    %3 = vector.load %arg2[%c0, %c0_1, %c0_2, %c0_3] : memref<1x2x16x64xf32, #tpu.memory_space<vmem>>, vector<1x2x16x64xf32>
    %4 = vector.shape_cast %3 : vector<1x2x16x64xf32> to vector<2x16x64xf32>
    %c0_4 = arith.constant 0 : index
    %c0_5 = arith.constant 0 : index
    %c0_6 = arith.constant 0 : index
    %c0_7 = arith.constant 0 : index
    %5 = vector.load %arg3[%c0_4, %c0_5, %c0_6, %c0_7] : memref<1x2x16x64xf32, #tpu.memory_space<vmem>>, vector<1x2x16x64xf32>
    %6 = vector.shape_cast %5 : vector<1x2x16x64xf32> to vector<2x16x64xf32>
    %cst = arith.constant dense<0.000000e+00> : vector<64xf32>
    %7 = vector.multi_reduction <add>, %4, %cst [0, 1] : vector<2x16x64xf32> to vector<64xf32>
    %8 = vector.shape_cast %7 : vector<64xf32> to vector<1x1x64xf32>
    %9 = vector.shape_cast %8 : vector<1x1x64xf32> to vector<1x64xf32>
    %cst_8 = arith.constant dense<0.000000e+00> : vector<64xf32>
    %10 = vector.multi_reduction <add>, %6, %cst_8 [0, 1] : vector<2x16x64xf32> to vector<64xf32>
    %11 = vector.shape_cast %10 : vector<64xf32> to vector<1x1x64xf32>
    %12 = vector.shape_cast %11 : vector<1x1x64xf32> to vector<1x64xf32>
    %c0_9 = arith.constant 0 : index
    %c0_10 = arith.constant 0 : index
    %13 = vector.load %arg7[%c0_9, %c0_10] : memref<1x128xf32, #tpu.memory_space<vmem>>, vector<1x128xf32>
    %14 = tpu.concatenate %9, %12 in 1 : vector<1x64xf32>, vector<1x64xf32> -> vector<1x128xf32>
    %15 = arith.addf %13, %14 : vector<1x128xf32>
    %c0_11 = arith.constant 0 : index
    %c0_12 = arith.constant 0 : index
    %16 = vector.load %arg7[%c0_11, %c0_12] : memref<1x128xf32, #tpu.memory_space<vmem>>, vector<1x128xf32>
    tpu.vector_store %arg7[%c0_11, %c0_12], %15 {strides = array<i32>} : memref<1x128xf32, #tpu.memory_space<vmem>>, vector<1x128xf32>,
    %c1_i32 = arith.constant 1 : i32
    %17 = arith.cmpi eq, %arg1, %c1_i32 : i32
    %18 = arith.extui %17 : i1 to i32
    %c0_i32_13 = arith.constant 0 : i32
    %19 = arith.cmpi ne, %18, %c0_i32_13 : i32
    scf.if %19 {
      %c0_14 = arith.constant 0 : index
      %c0_15 = arith.constant 0 : index
      %20 = vector.load %arg7[%c0_14, %c0_15] : memref<1x128xf32, #tpu.memory_space<vmem>>, vector<1x128xf32>
      %c0_16 = arith.constant 0 : index
      %c0_17 = arith.constant 0 : index
      %21 = vector.load %arg4[%c0_16, %c0_17] : memref<128x8xf32, #tpu.memory_space<vmem>>, vector<128x8xf32>
      %cst_18 = arith.constant dense<0.000000e+00> : vector<1x8xf32>
      %22 = tpu.matmul %20, %21, %cst_18 {dimension_numbers = #tpu.dot_dimension_numbers<[1], [0], [0], [1], [0, 0, 1, 1], [], []>} : vector<1x128xf32>, vector<128x8xf32>, vector<1x8xf32> -> vector<1x8xf32>
      %23 = arith.negf %22 : vector<1x8xf32>
      %24 = math.exp %23 : vector<1x8xf32>
      %cst_19 = arith.constant 1.000000e+00 : f32
      %25 = vector.broadcast %cst_19 : f32 to vector<1x8xf32>
      %26 = arith.addf %25, %24 : vector<1x8xf32>
      %27 = arith.divf %25, %26 : vector<1x8xf32>
      %cst_20 = arith.constant 1.000000e+00 : f32
      %28 = vector.broadcast %cst_20 : f32 to vector<1x8xf32>
      %29 = arith.addf %27, %28 : vector<1x8xf32>
      %c0_21 = arith.constant 0 : index
      %c0_22 = arith.constant 0 : index
      %30 = vector.load %arg5[%c0_21, %c0_22] : memref<8x128xf32, #tpu.memory_space<vmem>>, vector<8x128xf32>
      %cst_23 = arith.constant dense<0.000000e+00> : vector<1x128xf32>
      %31 = tpu.matmul %29, %30, %cst_23 {dimension_numbers = #tpu.dot_dimension_numbers<[1], [0], [0], [1], [0, 0, 1, 1], [], []>} : vector<1x8xf32>, vector<8x128xf32>, vector<1x128xf32> -> vector<1x128xf32>
      %c0_24 = arith.constant 0 : index
      %c0_25 = arith.constant 0 : index
      %c0_26 = arith.constant 0 : index
      %32 = vector.load %arg6[%c0_24, %c0_25, %c0_26] : memref<1x1x128xf32, #tpu.memory_space<vmem>>, vector<1x1x128xf32>
      %33 = vector.shape_cast %32 : vector<1x1x128xf32> to vector<1x128xf32>
      %34 = vector.shape_cast %31 : vector<1x128xf32> to vector<1x1x128xf32>
      tpu.vector_store %arg6[%c0_24, %c0_25, %c0_26], %34 {strides = array<i32>} : memref<1x1x128xf32, #tpu.memory_space<vmem>>, vector<1x1x128xf32>,
    } else {
    }
    return
  }
  func.func @transform_0(%arg0: i32, %arg1: i32) -> (i32, i32, i32, i32) {
    %c0_i32 = arith.constant 0 : i32
    %c0_i32_0 = arith.constant 0 : i32
    %c0_i32_1 = arith.constant 0 : i32
    return %arg0, %arg1, %c0_i32, %c0_i32_0 : i32, i32, i32, i32
  }
  func.func @transform_1(%arg0: i32, %arg1: i32) -> (i32, i32, i32, i32) {
    %c0_i32 = arith.constant 0 : i32
    %c0_i32_0 = arith.constant 0 : i32
    %c0_i32_1 = arith.constant 0 : i32
    return %arg0, %arg1, %c0_i32, %c0_i32_0 : i32, i32, i32, i32
  }
  func.func @transform_2(%arg0: i32, %arg1: i32) -> (i32, i32) {
    %c0_i32 = arith.constant 0 : i32
    %c0_i32_0 = arith.constant 0 : i32
    %c0_i32_1 = arith.constant 0 : i32
    return %c0_i32, %c0_i32_0 : i32, i32
  }
  func.func @transform_3(%arg0: i32, %arg1: i32) -> (i32, i32) {
    %c0_i32 = arith.constant 0 : i32
    %c0_i32_0 = arith.constant 0 : i32
    %c0_i32_1 = arith.constant 0 : i32
    return %c0_i32, %c0_i32_0 : i32, i32
  }
  func.func @transform_4(%arg0: i32, %arg1: i32) -> (i32, i32, i32) {
    %c0_i32 = arith.constant 0 : i32
    %c0_i32_0 = arith.constant 0 : i32
    %c0_i32_1 = arith.constant 0 : i32
    return %arg0, %c0_i32, %c0_i32_0 : i32, i32, i32
  }
}

</mosaic_0001>

<bundles_post_ra>
// kernel: tpu_custom_call.1
= control target key start
LH: loop header
LB: loop body
LE: loop exit
PB: predicated region body
PF: predicated region fallthrough
CT: control target
= control target key end

     0   :  { %9 = vsyncpa [#allocation4], 0  ;;  %s1308_s0 = inlined_call_operand.vmem [shape: f32[2,4,16,64], index: 0, kind: input, shape index: {}]   ;;  %s1309_s1 = inlined_call_operand.hbm [shape: f32[2,4,16,64], index: 1, kind: input, shape index: {}]   ;;  %s1310_s2 = inlined_call_operand.vmem [shape: f32[128,8], index: 2, kind: input, shape index: {}]   ;;  %s1311_s3 = inlined_call_operand.vmem [shape: f32[8,128], index: 3, kind: input, shape index: {}]   ;;  %s1312_s4 = inlined_call_operand.hbm [shape: f32[2,1,128], index: 4, kind: output, shape index: {}]  }
   0x1   :  { %11 = vsyncpa [#allocation4 + $0x1], 0 }
   0x2   :  { %12 = vsyncpa [#allocation5], 0 }
   0x3   :  { %14 = vsyncpa [#allocation5 + $0x1], 0  ;;  %s1015_s15 = smov 0   ;;  %s1017_s16 = smov 0  }
   0x4   :  { %s1019_s17 = smov 0   ;;  %s1021_s18 = smov 0  }
   0x5   :  { %s1023_s19 = smov 0   ;;  %s1025_s20 = smov 0  }
   0x6   :  { %s1027_s21 = smov 0   ;;  %s1029_s22 = smov 0  }
   0x7   :  { %s1031_s23 = smov 0   ;;  %s1033_s24 = smov 0  }
   0x8   :  { %s1035_s25 = smov 0  }
   0x9 LB: > { %1317 = sst [smem:[#allocation9_spill]] %s959_s20  ;;  %s608_s26 = sadd.s32 4294967295, %s979_s25   ;;  %s979_s25 = sphi %s1035_s25, %s20_s25   ;;  %s975_s24 = sphi %s1033_s24, %s1340_s24   ;;  %s971_s23 = sphi %s1031_s23, %s1339_s23   ;;  %s967_s22 = sphi %s1029_s22, %s1338_s22   ;;  %s963_s21 = sphi %s1027_s21, %s1337_s21   ;;  %s959_s20 = sphi %s1025_s20, %s1329_s20   ;;  %s955_s19 = sphi %s1023_s19, %s1336_s19   ;;  %s951_s18 = sphi %s1021_s18, %s1335_s18   ;;  %s947_s17 = sphi %s1019_s17, %s1334_s17   ;;  %s943_s16 = sphi %s1017_s16, %s1333_s16   ;;  %s939_s15 = sphi %s1015_s15, %s1332_s15  }
   0xa   : > { %s609_s27 = sadd.s32 4294967294, %s979_s25   ;;  %s29_s28 = sadd.s32 1, %s971_s23 }
   0xb   : > { %s32_s29 = sadd.s32 1, %s975_s24  ;;  %p30_p0 = scmp.ge.s32.totalorder %s29_s28, 2 }
   0xc   : > { %s69_s30 = sadd.s32 1, %s959_s20  ;;  %p76_p1 = scmp.ne.s32.totalorder %s959_s20, %s955_s19 }
   0xd   : > { %p77_p2 = scmp.eq.s32.totalorder %s979_s25, 0  ;;  %s1342_s28 = smov (%p30_p0, %s29_s28), 0 }
   0xe   : > { %1318 = sst [smem:[#allocation10_spill]] %s1342_s28  ;;  %s1344_s29 = smov (!%p30_p0, %s32_s29), %s975_s24 }
   0xf   : > { %s65_s5 = ssub.s32 %s971_s23, %s1342_s28  ;;  %p1081_p3 = por %p77_p2, %p76_p1 }
  0x10   : > { %p34_p4 = scmp.ge.s32.totalorder %s1344_s29, 2  ;;  %p82_p5 = scmp.ne.s32.totalorder %s955_s19, %s951_s18 }
  0x11   : > { %p83_p6 = scmp.eq.s32.totalorder %s608_s26, 0  ;;  %s137_s7 = sadd.s32 1, %s947_s17 }
  0x12   : > { %s1346_s29 = smov (%p34_p4, %s1344_s29), 0  ;;  %p147_p8 = scmp.ne.s32.totalorder %s947_s17, %s943_s16 }
  0x13   : > { %1320 = sst [smem:[#allocation11_spill]] %s1346_s29  ;;  %p1089_p7 = por %p83_p6, %p82_p5 }
  0x14   : > { %s64_s9 = ssub.s32 %s975_s24, %s1346_s29  ;;  %p148_p9 = scmp.eq.s32.totalorder %s608_s26, 3 }
  0x15   : > { %s66_s10 = sor.u32 %s65_s5, %s64_s9  ;;  %p135_p10 = scmp.eq.s32.totalorder %s64_s9, 0 }
  0x16   : > { %p67_p11 = scmp.eq.s32.totalorder %s66_s10, 0  ;;  %p1097_p12 = por %p148_p9, %p147_p8 }
  0x17   : > { %s1102_s12 = scalar_select %p135_p10, %s947_s17, %s137_s7  }
  0x18   : > { %s1322_s11 = scalar_select %p1097_p12, 1, 0 }
  0x19   : > { %s1105_s13 = scalar_select %p67_p11, %s959_s20, %s69_s30  }
  0x1a   : > { %p153_p13 = scmp.ne.s32.totalorder %s943_s16, %s939_s15  ;;  %p154_p0 = scmp.eq.s32.totalorder %s609_s27, 3 }
  0x1b   : > { %1323 = sst [smem:[#allocation12_spill]] %s1105_s13  ;;  %p726_p1 = scmp.lt.s32.totalorder %s979_s25, 4 }
  0x1c   : > { %p1110_p2 = por %p154_p0, %p153_p13  ;;  %s194_s18 = sand.u32 1, %s959_s20  }
  0x1d   : > { %s612_s26 = sshll.u32 %s194_s18, 5  ;;  %s630_s5 = sshll.u32 %s971_s23, 2 }
  0x1e   : > { %s1324_s14 = scalar_select %p1110_p2, 1, 0 }
  0x1f   : > { %s615_s9 = sshll.u32 %s975_s24, 3  ;;  %s198_s10 = scalar_lea.vmem [#allocation3], %s612_s26 }
  0x20   : > { %s208_s29 = sshll.u32 %s198_s10, 4  ;;  %s205_s28 = sadd.s32 %s630_s5, %s615_s9  ;;  %s1117_s29 = int_to_ptr.vmem [resolvable:$true] %s208_s29 }
  0x21   : > { %s616_s7 = sshll.u32 %s205_s28, 7  ;;  %p1121_p4 = pnand %p726_p1, %p1081_p3 }
  0x22   : > { %s1128_s20 = scalar_lea.hbm %s1309_s1, %s616_s7  ;;  %s1130_s26 = scalar_lea.sflag [#allocation4], %s194_s18 }
  0x23   : > { %s827_s5 = scalar_lea.hbm %s1128_s20, 512  ;;  %p829_p3 = pneg %p1121_p4 }
  0x24   : > { %p828_p5 = scmp.ne.s32.totalorder %s1128_s20, %s827_s5  ;;  %s832_s13 = scalar_lea.hbm %s1309_s1, 2048 }
  0x25   : > { %p833_p9 = scmp.lt.u32.totalorder %s1128_s20, %s1309_s1  ;;  %p834_p10 = scmp.lt.u32.totalorder %s832_s13, %s827_s5 }
  0x26   : > { %p830_p6 = pnand %p829_p3, %p828_p5  ;;  %p836_p13 = scmp.lt.u32.totalorder %s827_s5, %s1128_s20 }
  0x27   : > { %p835_p11 = por %p834_p10, %p833_p9 }
  0x28   : > { %p831_p8 = pneg %p830_p6 }
  0x29   : > { %p837_p0 = por %p836_p13, %p835_p11 }
  0x2b   : > { %p838_p1 = pnand %p837_p0, %p831_p8 }
  0x2d   : > { %841 = shalt.err (!%p838_p1)
}
  0x2e   : > { %s842_s18 = scalar_lea.vmem %s1117_s29, 512  ;;  %s981_s7 = smov [#allocation3]  }
  0x2f   : > { %p843_p5 = scmp.ne.s32.totalorder %s1117_s29, %s842_s18  ;;  %s847_s27 = sshll.u32 %s981_s7, 4  ;;  %s848_s27 = int_to_ptr.vmem [resolvable:$false] %s847_s27 }
  0x30   : > { %s849_s28 = scalar_lea.vmem %s848_s27, 1024  ;;  %p850_p12 = scmp.lt.s32.totalorder %s1117_s29, %s848_s27 }
  0x31   : > { %p845_p6 = pnand %p843_p5, %p829_p3  ;;  %p851_p9 = scmp.lt.s32.totalorder %s849_s28, %s842_s18 }
  0x33   : > { %p846_p2 = pneg %p845_p6  ;;  %p852_p10 = por %p851_p9, %p850_p12 }
  0x35   : > { %p853_p11 = pnand %p852_p10, %p846_p2 }
  0x37   : > { %856 = shalt.err (!%p853_p11)
}
  0x38   : > { %s982_s5 = smov 128   ;;  %s983_s6 = smov 8  }
  0x39   : > { %721 = dma.hbm_to_vmem [thread:$0]  (!%p1121_p4), %s1128_s20, 512, %s1117_s29, %s1130_s26, %s982_s5, %s982_s5, %s983_s6  }
  0x3a   : > { %p617_p3 = scmp.ge.s32.totalorder %s979_s25, 1  ;;  %p216_p8 = scmp.lt.s32.totalorder %s979_s25, 5 }
  0x3c   : > { %p217_p13 = pnand %p617_p3, %p216_p8 }
  0x3d   : > { %s222_s13 = sand.u32 (!%p217_p13), 1, %s955_s19  }
  0x3e   : > { %220 = sbr.rel (%p217_p13) target bundleno = 705 (0x2c1), region = 36  ;;  %s618_s9 = sshll.u32 (!%p217_p13), %s222_s13, 5 }
  0x3f   : > { %s223_s10 = scalar_lea.sflag (!%p217_p13), [#allocation4], %s222_s13  ;;  %s226_s18 = scalar_lea.vmem (!%p217_p13), [#allocation3], %s618_s9 }
  0x45   : > { %930 = dma.done.wait (%p1089_p7), %s223_s10, 512  }
  0x46   : > { %932 = vsyncadd (%p1089_p7), %s223_s10, 4294966784  ;;  %s258_s20 = sand.u32 1, %s943_s16   ;;  %s619_s29 = sshll.u32 %s963_s21, 1 }
  0x47   : > { %p261_p12 = scmp.lt.s32.totalorder %s967_s22, 1  ;;  %p263_p2 = scmp.lt.s32.totalorder %s619_s29, 3 }
  0x48   : > { %s1176_s13 = scalar_lea.vmem [#allocation6], %s258_s20  ;;  %p623_p7 = scmp.ne.s32.totalorder %s963_s21, 0 }
  0x49   : > { %s262_s30 = scalar_select %p261_p12, %s967_s22, 1 }
  0x4a   : > { %s1348_s29 = smov (!%p263_p2, %s619_s29), 3  ;;  %275 = sbr.rel (%p623_p7) target bundleno = 81 (0x51), region = 44 }
  0x4b   : > { %s621_s26 = sshll.u32 %s262_s30, 3  ;;  %s620_s7 = sshll.u32 %s1348_s29, 1  ;;  %v984_v0 = vmov (!%p623_p7), 0.0  }
  0x4c   : > { %s267_s27 = sadd.s32 %s621_s26, %s620_s7  ;;  %276 = vst [vmem:[#allocation2] sm:$0x1] (!%p623_p7), %v984_v0 }
  0x4d   : > { %s622_s28 = sshll.u32 %s267_s27, 3 }
  0x4e   : > { %s1172_s8 = scalar_lea.vmem %s1308_s0, %s622_s28 }
  0x51 PF: > { %v281_v1 = vld [vmem:[%s226_s18] sm:$0xff]  ;;  %v282_v2 = vld [vmem:[%s226_s18 + $0x8] sm:$0xff]  ;;  %v283_v3 = vld [vmem:[%s226_s18 + $0x10] sm:$0xff]  ;;  %vm285_vm0 = vcmask 523264   ;;  %s985_s9 = smov 64   ;;  %p624_p4 = scmp.ne.s32.totalorder %s963_s21, 1 }
  0x52   : > { %v284_v4 = vld [vmem:[%s226_s18 + $0x18] sm:$0xff]  ;;  %v299_v5 = vsel %vm285_vm0, %v281_v1, 0.0  ;;  %v300_v6 = vsel %vm285_vm0, %v282_v2, 0.0  ;;  %v302_v7 = vsel %vm285_vm0, %v283_v3, 0.0  ;;  %v278_v19 = vld [vmem:[%s1172_s8 + $0x8] sm:$0xff]  ;;  %v279_v22 = vld [vmem:[%s1172_s8 + $0x10] sm:$0xff] }
  0x53   : > { %v301_v8 = vadd.f32 %v300_v6, %v299_v5  ;;  %v304_v9 = vsel %vm285_vm0, %v284_v4, 0.0  ;;  %v277_v18 = vld [vmem:[%s1172_s8] sm:$0xff]  ;;  %v287_v21 = vsel %vm285_vm0, %v278_v19, 0.0  ;;  %v289_v24 = vsel %vm285_vm0, %v279_v22, 0.0  ;;  %v280_v25 = vld [vmem:[%s1172_s8 + $0x18] sm:$0xff]  ;;  %v326_v40 = vld [vmem:[%s1310_s2 + $0x8] sm:$0xff] (!%p624_p4) }
  0x54   : > { %v286_v20 = vsel %vm285_vm0, %v277_v18, 0.0  ;;  %v291_v27 = vsel %vm285_vm0, %v280_v25, 0.0  ;;  %v312_v35 = vld [vmem:[#allocation2] sm:$0x1]  ;;  %v327_v41 = vld [vmem:[%s1310_s2 + $0x10] sm:$0xff] (!%p624_p4)  ;;  %v986_v42 = vmov (!%p624_p4), 0.0|0.0  }
  0x55   : > { %v303_v10 = vadd.f32 %v302_v7, %v301_v8  ;;  %v288_v23 = vadd.f32 %v287_v21, %v286_v20  ;;  %v325_v39 = vld [vmem:[%s1310_s2] sm:$0xff] (!%p624_p4)  ;;  %690 = vmatprep.subr.bf16.mxu0 (!%p624_p4), %v986_v42  ;;  %v328_v44 = vld [vmem:[%s1310_s2 + $0x18] sm:$0xff] (!%p624_p4)  ;;  %vm987_vm1 = vmmov (!%p624_p4), 0   ;;  %v988_v45 = vmov (!%p624_p4), 0.0   ;;  %v330_v48 = vld [vmem:[%s1310_s2 + $0x28] sm:$0xff] (!%p624_p4) }
  0x56   : > { %v691_v43 = vpack.c.bf16 (!%p624_p4), %v326_v40, %v325_v39  ;;  %682 = vmatprep.mubr.msk.f32.mxu0 (!%p624_p4), %vm987_vm1, %v988_v45  ;;  %685 = vmatprep.subr.mxu1 (!%p624_p4), %v988_v45  ;;  %v694_v46 = vpack.c.bf16 (!%p624_p4), %v328_v44, %v327_v41  ;;  %v329_v47 = vld [vmem:[%s1310_s2 + $0x20] sm:$0xff] (!%p624_p4)  ;;  %v331_v50 = vld [vmem:[%s1310_s2 + $0x30] sm:$0xff] (!%p624_p4)  ;;  %v332_v51 = vld [vmem:[%s1310_s2 + $0x38] sm:$0xff] (!%p624_p4)  ;;  %vm419_vm2 = vcmask (!%p624_p4), 64512  }
  0x57   : > { %v305_v11 = vadd.f32 %v304_v9, %v303_v10  ;;  %v290_v26 = vadd.f32 %v289_v24, %v288_v23  ;;  %687 = vmatprep.mubr.msk.f32.mxu1 (!%p624_p4), %vm987_vm1, %v988_v45  ;;  %v697_v49 = vpack.c.bf16 (!%p624_p4), %v330_v48, %v329_v47  ;;  %v700_v52 = vpack.c.bf16 (!%p624_p4), %v332_v51, %v331_v50  ;;  %v333_v53 = vld [vmem:[%s1310_s2 + $0x40] sm:$0xff] (!%p624_p4)  ;;  %v334_v54 = vld [vmem:[%s1310_s2 + $0x48] sm:$0xff] (!%p624_p4)  ;;  %v335_v56 = vld [vmem:[%s1310_s2 + $0x50] sm:$0xff] (!%p624_p4) }
  0x58   : > { %692 = vmatpush3.bf16.msra.mxu0 (!%p624_p4), %v691_v43  ;;  %v703_v55 = vpack.c.bf16 (!%p624_p4), %v334_v54, %v333_v53  ;;  %v336_v57 = vld [vmem:[%s1310_s2 + $0x58] sm:$0xff] (!%p624_p4)  ;;  %v337_v59 = vld [vmem:[%s1310_s2 + $0x60] sm:$0xff] (!%p624_p4)  ;;  %v338_v60 = vld [vmem:[%s1310_s2 + $0x68] sm:$0xff] (!%p624_p4) }
  0x59   : > { %v306_v12 = vrot.slane %v305_v11, 4  ;;  %v292_v28 = vadd.f32 %v291_v27, %v290_v26  ;;  %693 = vmatprep.subr.bf16.mxu0 (!%p624_p4), %v986_v42  ;;  %v706_v58 = vpack.c.bf16 (!%p624_p4), %v336_v57, %v335_v56  ;;  %v709_v61 = vpack.c.bf16 (!%p624_p4), %v338_v60, %v337_v59  ;;  %v339_v62 = vld [vmem:[%s1310_s2 + $0x70] sm:$0xff] (!%p624_p4)  ;;  %v340_v63 = vld [vmem:[%s1310_s2 + $0x78] sm:$0xff] (!%p624_p4)  ;;  %v418_v2 = vld [vmem:[%s1311_s3] sm:$0xff] (!%p624_p4) }
  0x5a   : > { %v712_v0 = vpack.c.bf16 (!%p624_p4), %v340_v63, %v339_v62  ;;  %686 = vmatpush3.msra.mxu1 (!%p624_p4), %v418_v2 }
  0x5b   : > { %v307_v13 = vadd.f32 %v306_v12, %v305_v11  ;;  %v293_v29 = vrot.slane %v292_v28, 4 }
  0x5c   : > { %695 = vmatpush3.bf16.msra.mxu0 (!%p624_p4), %v694_v46 }
  0x5d   : > { %v308_v14 = vrot.slane %v307_v13, 2  ;;  %v294_v30 = vadd.f32 %v293_v29, %v292_v28  ;;  %696 = vmatprep.subr.bf16.mxu0 (!%p624_p4), %v986_v42 }
  0x5f   : > { %v309_v15 = vadd.f32 %v308_v14, %v307_v13  ;;  %v295_v31 = vrot.slane %v294_v30, 2 }
  0x60   : > { %698 = vmatpush3.bf16.msra.mxu0 (!%p624_p4), %v697_v49 }
  0x61   : > { %v310_v16 = vrot.slane %v309_v15, 1  ;;  %v296_v32 = vadd.f32 %v295_v31, %v294_v30  ;;  %699 = vmatprep.subr.bf16.mxu0 (!%p624_p4), %v986_v42 }
  0x63   : > { %v311_v17 = vadd.f32 %v310_v16, %v309_v15  ;;  %v297_v33 = vrot.slane %v296_v32, 1 }
  0x64   : > { %701 = vmatpush3.bf16.msra.mxu0 (!%p624_p4), %v700_v52 }
  0x65   : > { %314 = vrot.lane.b32.xlu0 %v311_v17, %s985_s9  ;;  %v298_v34 = vadd.f32 %v297_v33, %v296_v32  ;;  %702 = vmatprep.subr.bf16.mxu0 (!%p624_p4), %v986_v42 }
  0x68   : > { %704 = vmatpush3.bf16.msra.mxu0 (!%p624_p4), %v703_v55 }
  0x69   : > { %705 = vmatprep.subr.bf16.mxu0 (!%p624_p4), %v986_v42 }
  0x6c   : > { %707 = vmatpush3.bf16.msra.mxu0 (!%p624_p4), %v706_v58 }
  0x6d   : > { %708 = vmatprep.subr.bf16.mxu0 (!%p624_p4), %v986_v42 }
  0x70   : > { %710 = vmatpush3.bf16.msra.mxu0 (!%p624_p4), %v709_v61 }
  0x71   : > { %711 = vmatprep.subr.bf16.mxu0 (!%p624_p4), %v986_v42 }
  0x74   : > { %713 = vmatpush3.bf16.msra.mxu0 (!%p624_p4), %v712_v0 }
  0xd5   : > { %323 = sbr.rel (%p624_p4) target bundleno = 680 (0x2a8), region = 48 }
  0xd7   : > { %v315_v36 = vpop.permute.xlu0 %314 }
  0xd8   : > { %v317_v37 = vsel %vm285_vm0, %v298_v34, %v315_v36 }
  0xd9   : > { %v318_v38 = vadd.f32 %v317_v37, %v312_v35 }
  0xdb   : > { %319 = vst [vmem:[#allocation2] sm:$0x1] %v318_v38 }
  0xe2   : > { %v324_v1 = vld [vmem:[#allocation2] sm:$0x1] }
  0xe3   : > { %683 = vmatmul.mubr.f32.vlgmr.msra.gmra.mrb[0].mxu0 %v324_v1 }
 0x1b6   : > { %v407_v3 = vpop.f32.mrb[0].mxu0 }
 0x1b7   : > { %v625_v4 = vmul.f32 -1.442695, %v407_v3  ;;  %v684_v5 = vpop.f32.mrb[1].mxu0 }
 0x1b9   : > { %823 = vpow2.f32 %v625_v4 }
 0x1c3   : > { %v824_v6 = vpop.eup %823 }
 0x1c4   : > { %v414_v7 = vadd.f32 1.0, %v824_v6 }
 0x1c6   : > { %825 = vrcp.f32 %v414_v7 }
 0x1d0   : > { %v826_v8 = vpop.eup %825 }
 0x1d1   : > { %v417_v9 = vadd.f32 1.0, %v826_v8 }
 0x1d3   : > { %688 = vmatmul.mubr.msk.f32.vlgmr.msra.gmra.mrb[0].mxu1 %vm419_vm2, %v417_v9 }
 0x2a6   : > { %v489_v10 = vpop.f32.mrb[0].mxu1 }
 0x2a7   : > { %493 = vst [vmem:[%s1176_s13] sm:$0x1] %v489_v10  ;;  %v689_v11 = vpop.f32.mrb[1].mxu1 }
 0x2a8 PF: > { %s627_s21 = sshll.u32 %s967_s22, 4  ;;  %s507_s9 = sshll.u32 %s1176_s13, 4  ;;  %s508_s9 = int_to_ptr.vmem [resolvable:$true] %s507_s9 }
 0x2a9   : > { %s1249_s8 = scalar_lea.hbm %s1312_s4, %s627_s21  ;;  %s495_s10 = scalar_lea.sflag [#allocation5], %s258_s20 }
 0x2aa   : > { %s857_s18 = scalar_lea.vmem %s508_s9, 16  ;;  %p1326_p1 = scmp.ne.s32.totalorder %s1322_s11, 0 }
 0x2ab   : > { %p858_p0 = scmp.ne.s32.totalorder %s508_s9, %s857_s18  ;;  %s989_s29 = smov [#allocation6]  }
 0x2ac   : > { %s861_s30 = sshll.u32 %s989_s29, 4  ;;  %s862_s30 = int_to_ptr.vmem [resolvable:$false] %s861_s30 }
 0x2ad   : > { %p859_p5 = pnand %p858_p0, %p1326_p1  ;;  %s863_s26 = scalar_lea.vmem %s862_s30, 32 }
 0x2ae   : > { %p864_p9 = scmp.lt.s32.totalorder %s508_s9, %s862_s30  ;;  %p865_p10 = scmp.lt.s32.totalorder %s863_s26, %s857_s18 }
 0x2af   : > { %p860_p6 = pneg %p859_p5 }
 0x2b0   : > { %p866_p11 = por %p865_p10, %p864_p9 }
 0x2b2   : > { %p867_p3 = pnand %p866_p11, %p860_p6 }
 0x2b4   : > { %870 = shalt.err (!%p867_p3)
}
 0x2b5   : > { %s871_s22 = scalar_lea.hbm %s1249_s8, 16  ;;  %s875_s7 = scalar_lea.hbm %s1312_s4, 32 }
 0x2b6   : > { %p872_p8 = scmp.ne.s32.totalorder %s1249_s8, %s871_s22  ;;  %p876_p2 = scmp.lt.u32.totalorder %s1249_s8, %s1312_s4 }
 0x2b7   : > { %p877_p7 = scmp.lt.u32.totalorder %s875_s7, %s871_s22  ;;  %p879_p0 = scmp.lt.u32.totalorder %s871_s22, %s1249_s8 }
 0x2b8   : > { %p873_p13 = pnand %p872_p8, %p1326_p1 }
 0x2b9   : > { %p878_p4 = por %p877_p7, %p876_p2 }
 0x2ba   : > { %p874_p12 = pneg %p873_p13 }
 0x2bb   : > { %p880_p5 = por %p879_p0, %p878_p4 }
 0x2bd   : > { %p881_p6 = pnand %p880_p5, %p874_p12 }
 0x2bf   : > { %884 = shalt.err (!%p881_p6)
}
 0x2c0   : > { %716 = dma.vmem_to_hbm [thread:$0]  (%p1326_p1), %s508_s9, 16, %s1249_s8, %s495_s10  }
 0x2c1 PF: > { %p727_p9 = scmp.ge.s32.totalorder %s979_s25, 2  ;;  %s519_s21 = sand.u32 1, %s939_s15  }
 0x2c2   : > { %p1327_p10 = scmp.ne.s32.totalorder %s1324_s14, 0  ;;  %s520_s5 = scalar_lea.sflag [#allocation5], %s519_s21 }
 0x2c4   : > { %p723_p11 = pnand %p727_p9, %p1327_p10 }
 0x2c6   : > { %934 = dma.done.wait (!%p723_p11), %s520_s5, 16  }
 0x2c7   : > { %936 = vsyncadd (!%p723_p11), %s520_s5, 4294967280  ;;  %s20_s25 = sadd.s32 1, %s979_s25   ;;  %s1328_s11 = sld [smem:[#allocation9_spill]] }
 0x2c8   : > { %p17_p3 = scmp.ge.s32.totalorder %s20_s25, 6   ;;  %s1329_s20 = sld [smem:[#allocation12_spill]] }
 0x2c9   : > { %s1330_s6 = sld [smem:[#allocation10_spill]]  ;;  %s1331_s8 = sld [smem:[#allocation11_spill]] }
 0x2ca   : > { %s1332_s15 = smov %s943_s16  ;;  %s1333_s16 = smov %s947_s17 }
 0x2cb   : > { %s1334_s17 = smov %s1102_s12  ;;  %s1335_s18 = smov %s955_s19 }
 0x2cc   : > { %s1337_s21 = smov %s971_s23  ;;  %s1338_s22 = smov %s975_s24 }
 0x2cd   : > { %s1336_s19 = smov %s1328_s11  ;;  %19 = sbr.rel (!%p17_p3) target bundleno = 9 (0x9), region = 92 }
 0x2cf   : > { %s1339_s23 = smov %s1330_s6  ;;  %s1340_s24 = smov %s1331_s8 }
 0x2d4   :  { %524 = vsyncpa [#allocation4], 1 }
 0x2d5   :  { %526 = vsyncpa [#allocation4 + $0x1], 1 }
 0x2d6   :  { %527 = vsyncpa [#allocation5], 1 }
 0x2d7   :  { %529 = vsyncpa [#allocation5 + $0x1], 1 }

</bundles_post_ra>
